<compile_context>
chip_gen: v7x
topology: tpu7x:2x2x1
jax: 0.10.0
libtpu: 0.0.40
codegen_flags: <defaults>
</compile_context>

<pallas_src>
import functools
import math

import jax
import jax.numpy as jnp
from jax.experimental import pallas as pl
from jax.experimental.pallas import tpu as pltpu


_STEP_BYTES = 400_000      # ~0.35 us fixed per-grid-step overhead, in HBM-bytes
_CHUNK_CAP = 512           # max lane width per inner column chunk
_VMEM_FLOOR = 16 << 20
_VMEM_CEIL = 48 << 20      # stays well under v7x's 64 MiB physical VMEM


# --------------------------------------------------------------------------
# helpers
# --------------------------------------------------------------------------

def _round_up(x, m):
    return (x + m - 1) // m * m


def _lane_tile(x, n):
    """Repeat x n times along the last (lane) axis.

    Exact pure data movement; built by binary doubling (log2(n) concats).
    Only used for the small per-step base (width <= _CHUNK_CAP lanes).
    """
    if n == 1:
        return x
    reps = []
    chunk = x
    m = n
    while m > 0:
        if m & 1:
            reps.append(chunk)
        m >>= 1
        if m:
            chunk = jnp.concatenate([chunk, chunk], axis=-1)
    out = reps[0]
    for r in reps[1:]:
        out = jnp.concatenate([out, r], axis=-1)
    return out


def _sigmoid(x):
    # Single EUP push (tanh) instead of exp + reciprocal.
    return 0.5 * jnp.tanh(0.5 * x) + 0.5


@functools.lru_cache(maxsize=None)
def _choose_tiles(bv, bt, d, tv_cap, lane_cap, sv, out_itemsize):
    """Jointly pick (TV, Bv_pad, TBt, Bt_pad).

    Constraints: TBt multiple of q = lcm(D,128)/D (lane-dense, unmasked vst);
    TV multiple of the output sublane quantum `sv`.  Objective: minimize
    padded-output HBM bytes + (#grid steps) * _STEP_BYTES.  If the best grid
    is 1x1, fall back to the cheapest >=2-block candidate (v7x has 2 TCs).
    """
    q = math.lcm(d, 128) // d
    tbt_hi = min(max(q, (lane_cap // d) // q * q), _round_up(bt, q))
    tv_hi = min(max(sv, tv_cap // sv * sv), _round_up(bv, sv))

    tv_cands = [m * sv for m in range(1, tv_hi // sv + 1)]
    tbt_cands = [m * q for m in range(1, tbt_hi // q + 1)]

    best = None
    best_multi = None
    for tv in tv_cands:
        bv_pad = _round_up(bv, tv)
        for tbt in tbt_cands:
            bt_pad = _round_up(bt, tbt)
            blocks = (bv_pad // tv) * (bt_pad // tbt)
            cost = bv_pad * bt_pad * d * out_itemsize + blocks * _STEP_BYTES
            cand = (cost, tv, bv_pad, tbt, bt_pad, blocks)
            if best is None or cost < best[0]:
                best = cand
            if blocks >= 2 and (best_multi is None or cost < best_multi[0]):
                best_multi = cand
    if best[5] == 1 and best_multi is not None:
        best = best_multi
    _, tv, bv_pad, tbt, bt_pad, _ = best
    return tv, bv_pad, tbt, bt_pad


@functools.lru_cache(maxsize=None)
def _choose_chunk(d, n_flat):
    """Column-chunk width: multiple of lcm(D,128), divides n_flat, <= cap."""
    unit = math.lcm(d, 128)
    n_units = n_flat // unit
    cap = max(_CHUNK_CAP, unit)
    upc = 1
    for m in range(1, n_units + 1):
        if n_units % m == 0 and m * unit <= cap:
            upc = m
    return upc * unit, n_units // upc


# --------------------------------------------------------------------------
# kernels — inputs are already projected; kernels are broadcast + elementwise.
# v-side refs: (TV, D);  t-side refs: (1, TBt*D);  output ref: (TV, TBt*D).
# Each kernel builds a small lane-dense base per v-operand and loops over the
# output in lane-aligned column chunks (static, fully unrolled short loop).
# --------------------------------------------------------------------------

def _soft_att_kernel(g_ref, t_ref, o_ref, *, d, chunk, n_chunks):
    # out[i, j, :] = gate[i] * text[j]
    g = _lane_tile(g_ref[...], chunk // d)                    # (TV, chunk)
    for c in range(n_chunks):
        lo = c * chunk
        o_ref[:, lo:lo + chunk] = (g * t_ref[:, lo:lo + chunk]).astype(o_ref.dtype)


def _fusion_att_kernel(a1_ref, a2_ref, c1_ref, c2_ref, o_ref, *, d, chunk, n_chunks):
    # out[i, j, :] = sigmoid(a1[i] + c1[j]) * (a2[i] + c2[j])
    rep = chunk // d
    a1 = _lane_tile(a1_ref[...], rep)                         # (TV, chunk)
    a2 = _lane_tile(a2_ref[...], rep)
    for c in range(n_chunks):
        lo = c * chunk
        h1 = _sigmoid(a1 + c1_ref[:, lo:lo + chunk])
        h2 = a2 + c2_ref[:, lo:lo + chunk]
        o_ref[:, lo:lo + chunk] = (h1 * h2).astype(o_ref.dtype)


def _similarity_att_kernel(vv_ref, tt_ref, o_ref, *, d, chunk, n_chunks):
    # out[i, j, :] = sigmoid(vv[i] * tt[j]) * tt[j]
    vv = _lane_tile(vv_ref[...], chunk // d)                  # (TV, chunk)
    for c in range(n_chunks):
        lo = c * chunk
        tt = tt_ref[:, lo:lo + chunk]
        o_ref[:, lo:lo + chunk] = (_sigmoid(vv * tt) * tt).astype(o_ref.dtype)


# --------------------------------------------------------------------------
# launcher
# --------------------------------------------------------------------------

def _launch(kernel, v_arrs, t_arrs, bv, bt, d, out_dtype, tv_cap, lane_cap):
    out_itemsize = jnp.dtype(out_dtype).itemsize
    sv = max(8, 32 // out_itemsize)        # output sublane quantum (f32:8, bf16:16)
    tv, bv_pad, tbt, bt_pad = _choose_tiles(
        bv, bt, d, tv_cap, lane_cap, sv, out_itemsize)
    n_flat = tbt * d
    chunk, n_chunks = _choose_chunk(d, n_flat)

    def pad_rows(a, rows):
        a = a.astype(jnp.float32)
        if a.shape[0] == rows:
            return a
        return jnp.pad(a, ((0, rows - a.shape[0]), (0, 0)))

    # ragged edges zero-padded (inputs are tiny); text flattened to (1, Bt_pad*D)
    v_in = [pad_rows(a, bv_pad) for a in v_arrs]
    t_in = [pad_rows(a, bt_pad).reshape(1, bt_pad * d) for a in t_arrs]

    grid = (bv_pad // tv, bt_pad // tbt)
    in_specs = ([pl.BlockSpec((tv, d), lambda i, j: (i, 0))] * len(v_in)
                + [pl.BlockSpec((1, n_flat), lambda i, j: (0, j))] * len(t_in))
    out_spec = pl.BlockSpec((tv, n_flat), lambda i, j: (i, j))

    # VMEM budget: double-buffered in/out tiles + in-kernel bases/temporaries.
    in_bytes = len(v_in) * tv * d * 4 + len(t_in) * n_flat * 4
    out_bytes = tv * n_flat * out_itemsize
    tmp_bytes = (len(v_in) + 6) * tv * chunk * 4
    vmem_limit = int(min(max(2 * (in_bytes + out_bytes) + tmp_bytes + (4 << 20),
                             _VMEM_FLOOR), _VMEM_CEIL))

    out_flat = pl.pallas_call(
        functools.partial(kernel, d=d, chunk=chunk, n_chunks=n_chunks),
        out_shape=jax.ShapeDtypeStruct((bv_pad, bt_pad * d), out_dtype),
        grid_spec=pl.GridSpec(grid=grid, in_specs=in_specs, out_specs=out_spec),
        compiler_params=pltpu.CompilerParams(
            dimension_semantics=("parallel", "parallel"),
            vmem_limit_bytes=vmem_limit),
    )(*v_in, *t_in)

    # restore (Bv, Bt, D); skip the XLA slice copy entirely when unpadded
    if bv_pad == bv and bt_pad == bt:
        return out_flat.reshape(bv, bt, d)
    return out_flat[:bv, :bt * d].reshape(bv, bt, d)


# --------------------------------------------------------------------------
# module
# --------------------------------------------------------------------------

class CrossAttentionPallas:
    """Pallas port of AMFMN CrossAttention (soft_att / fusion_att / similarity_att).

    out_dtype=jnp.float32 matches the PyTorch module bit-for-bit semantics;
    out_dtype=jnp.bfloat16 is the performance option (halves HBM writeback in
    this write-bound kernel).
    """

    def __init__(self, att_type, dim, key, *, out_dtype=jnp.float32,
                 tv_cap=512, lane_cap=4096):
        self.att_type = att_type
        self.dim = dim
        self.out_dtype = out_dtype
        self.tv_cap = tv_cap
        self.lane_cap = lane_cap
        k = jax.random.split(key, 8)

        def lin(kw, kb, d_in, d_out):
            bound = 1.0 / float(math.sqrt(d_in))
            w = jax.random.uniform(kw, (d_in, d_out), jnp.float32, -bound, bound)
            b = jax.random.uniform(kb, (1, d_out), jnp.float32, -bound, bound)
            return w, b

        if att_type == 'soft_att':
            self.w, self.b = lin(k[0], k[1], dim, dim)
        elif att_type == 'fusion_att':
            w1, self.b1 = lin(k[0], k[1], 2 * dim, dim)
            w2, self.b2 = lin(k[2], k[3], 2 * dim, dim)
            # split the (2D, D) weight into visual / text halves
            self.w1v, self.w1t = w1[:dim], w1[dim:]
            self.w2v, self.w2t = w2[:dim], w2[dim:]
        elif att_type == 'similarity_att':
            self.w_v, self.b_v = lin(k[0], k[1], dim, dim)
            self.w_t, self.b_t = lin(k[2], k[3], dim, dim)
        else:
            raise Exception

    def __call__(self, visual, text):
        bv, d = visual.shape
        bt, _ = text.shape
        assert d == self.dim

        # Hoisted projections (tiny matmuls; biases folded) — once in the
        # wrapper instead of per grid step inside the kernel.
        if self.att_type == 'soft_att':
            gate = jax.nn.sigmoid(visual @ self.w + self.b)          # (Bv, D)
            return _launch(_soft_att_kernel, [gate], [text],
                           bv, bt, d, self.out_dtype, self.tv_cap, self.lane_cap)
        elif self.att_type == 'fusion_att':
            a1 = visual @ self.w1v + self.b1                         # (Bv, D)
            a2 = visual @ self.w2v + self.b2
            c1 = text @ self.w1t                                     # (Bt, D)
            c2 = text @ self.w2t
            return _launch(_fusion_att_kernel, [a1, a2], [c1, c2],
                           bv, bt, d, self.out_dtype, self.tv_cap, self.lane_cap)
        else:  # similarity_att
            vv = visual @ self.w_v + self.b_v                        # (Bv, D)
            tt = text @ self.w_t + self.b_t                          # (Bt, D)
            return _launch(_similarity_att_kernel, [vv], [tt],
                           bv, bt, d, self.out_dtype, self.tv_cap, self.lane_cap)

    # pure-JAX reference mirroring the PyTorch forward
    def reference(self, visual, text):
        if self.att_type == 'soft_att':
            gate = jax.nn.sigmoid(visual @ self.w + self.b)
            return gate[:, None, :] * text[None, :, :]
        elif self.att_type == 'fusion_att':
            a1 = visual @ self.w1v
            c1 = text @ self.w1t
            a2 = visual @ self.w2v
            c2 = text @ self.w2t
            h1 = jax.nn.sigmoid(a1[:, None, :] + c1[None, :, :] + self.b1)
            h2 = a2[:, None, :] + c2[None, :, :] + self.b2
            return h1 * h2
        else:
            vv = visual @ self.w_v + self.b_v
            tt = text @ self.w_t + self.b_t
            sims = vv[:, None, :] * tt[None, :, :]
            return jax.nn.sigmoid(sims) * tt[None, :, :]


if __name__ == "__main__":
    key = jax.random.PRNGKey(0)
    k_v, k_t, k_p = jax.random.split(key, 3)

    DIM = 32     # embed_dim
    BV = 20      # visual batch (ragged -> exercises adaptive row tiling)
    BT = 70      # text batch   (ragged -> adaptive TBt keeps padding at 2 rows)

    visual = jax.random.normal(k_v, (BV, DIM), jnp.float32)
    text = jax.random.normal(k_t, (BT, DIM), jnp.float32)

    ok = True
    for att_type in ('soft_att', 'fusion_att', 'similarity_att'):
        mod = CrossAttentionPallas(att_type, DIM, k_p)
        out = mod(visual, text)
        jax.block_until_ready(out)
        ref = mod.reference(visual, text)
        if out.shape != (BV, BT, DIM):
            ok = False
            print(f"BAD SHAPE in {att_type}: {out.shape}")
        elif not bool(jnp.allclose(out, ref, atol=5e-5, rtol=5e-5)):
            ok = False
            print(f"MISMATCH in {att_type}: max_err="
                  f"{float(jnp.max(jnp.abs(out - ref)))}")

    # bf16 performance path (halves HBM writeback) — loose-tolerance smoke test.
    mod_bf16 = CrossAttentionPallas('soft_att', DIM, k_p, out_dtype=jnp.bfloat16)
    out_bf16 = mod_bf16(visual, text)
    jax.block_until_ready(out_bf16)
    ref = mod_bf16.reference(visual, text)
    if out_bf16.shape != (BV, BT, DIM) or not bool(
            jnp.allclose(out_bf16.astype(jnp.float32), ref, atol=5e-2, rtol=5e-2)):
        ok = False
        print("MISMATCH in bf16 soft_att")

    if ok:
        print("KERNEL_OK")
</pallas_src>

<mosaic_0001>
module attributes {stable_mosaic.version = 11 : i64} {
  func.func @_soft_att_kernel(%arg0: i32, %arg1: i32, %arg2: memref<24x32xf32, #tpu.memory_space<vmem>>, %arg3: memref<1x1152xf32, #tpu.memory_space<vmem>>, %arg4: memref<24x1152xf32, #tpu.memory_space<vmem>>) attributes {dimension_semantics = [#tpu.dimension_semantics<parallel>, #tpu.dimension_semantics<parallel>], iteration_bounds = array<i64: 1, 2>, scalar_prefetch = 0 : i64, scratch_operands = 0 : i64, tpu.core_type = #tpu.core_type<tc>, window_params = [{transform_indices = @transform_0, window_bounds = array<i64: 24, 32>}, {transform_indices = @transform_1, window_bounds = array<i64: 1, 1152>}, {transform_indices = @transform_2, window_bounds = array<i64: 24, 1152>}]} {
    %c0 = arith.constant 0 : index
    %c0_0 = arith.constant 0 : index
    %0 = vector.load %arg2[%c0, %c0_0] : memref<24x32xf32, #tpu.memory_space<vmem>>, vector<24x32xf32>
    %1 = tpu.concatenate %0, %0 in 1 : vector<24x32xf32>, vector<24x32xf32> -> vector<24x64xf32>
    %2 = tpu.concatenate %1, %1 in 1 : vector<24x64xf32>, vector<24x64xf32> -> vector<24x128xf32>
    %3 = tpu.concatenate %2, %2 in 1 : vector<24x128xf32>, vector<24x128xf32> -> vector<24x256xf32>
    %4 = tpu.concatenate %2, %3 in 1 : vector<24x128xf32>, vector<24x256xf32> -> vector<24x384xf32>
    %c0_1 = arith.constant 0 : index
    %c0_2 = arith.constant 0 : index
    %5 = vector.load %arg3[%c0_1, %c0_2] : memref<1x1152xf32, #tpu.memory_space<vmem>>, vector<1x384xf32>
    %6 = vector.broadcast %5 : vector<1x384xf32> to vector<24x384xf32>
    %7 = arith.mulf %4, %6 : vector<24x384xf32>
    %c0_3 = arith.constant 0 : index
    %c0_4 = arith.constant 0 : index
    %8 = vector.load %arg4[%c0_3, %c0_4] : memref<24x1152xf32, #tpu.memory_space<vmem>>, vector<24x384xf32>
    tpu.vector_store %arg4[%c0_3, %c0_4], %7 {strides = array<i32>} : memref<24x1152xf32, #tpu.memory_space<vmem>>, vector<24x384xf32>,
    %c0_5 = arith.constant 0 : index
    %c384 = arith.constant 384 : index
    %9 = vector.load %arg3[%c0_5, %c384] : memref<1x1152xf32, #tpu.memory_space<vmem>>, vector<1x384xf32>
    %10 = vector.broadcast %9 : vector<1x384xf32> to vector<24x384xf32>
    %11 = arith.mulf %4, %10 : vector<24x384xf32>
    %c0_6 = arith.constant 0 : index
    %c384_7 = arith.constant 384 : index
    %12 = vector.load %arg4[%c0_6, %c384_7] : memref<24x1152xf32, #tpu.memory_space<vmem>>, vector<24x384xf32>
    tpu.vector_store %arg4[%c0_6, %c384_7], %11 {strides = array<i32>} : memref<24x1152xf32, #tpu.memory_space<vmem>>, vector<24x384xf32>,
    %c0_8 = arith.constant 0 : index
    %c768 = arith.constant 768 : index
    %13 = vector.load %arg3[%c0_8, %c768] : memref<1x1152xf32, #tpu.memory_space<vmem>>, vector<1x384xf32>
    %14 = vector.broadcast %13 : vector<1x384xf32> to vector<24x384xf32>
    %15 = arith.mulf %4, %14 : vector<24x384xf32>
    %c0_9 = arith.constant 0 : index
    %c768_10 = arith.constant 768 : index
    %16 = vector.load %arg4[%c0_9, %c768_10] : memref<24x1152xf32, #tpu.memory_space<vmem>>, vector<24x384xf32>
    tpu.vector_store %arg4[%c0_9, %c768_10], %15 {strides = array<i32>} : memref<24x1152xf32, #tpu.memory_space<vmem>>, vector<24x384xf32>,
    return
  }
  func.func @transform_0(%arg0: i32, %arg1: i32) -> (i32, i32) {
    %c0_i32 = arith.constant 0 : i32
    %c0_i32_0 = arith.constant 0 : i32
    return %arg0, %c0_i32 : i32, i32
  }
  func.func @transform_1(%arg0: i32, %arg1: i32) -> (i32, i32) {
    %c0_i32 = arith.constant 0 : i32
    %c0_i32_0 = arith.constant 0 : i32
    return %c0_i32, %arg1 : i32, i32
  }
  func.func @transform_2(%arg0: i32, %arg1: i32) -> (i32, i32) {
    %c0_i32 = arith.constant 0 : i32
    return %arg0, %arg1 : i32, i32
  }
}

</mosaic_0001>

<bundles_post_ra>
// kernel: tpu_custom_call.1
= control target key start
LH: loop header
LB: loop body
LE: loop exit
PB: predicated region body
PF: predicated region fallthrough
CT: control target
= control target key end

     0   :  { %7 = vsyncpa [#allocation3], 0  ;;  %s967_s0 = inlined_call_operand.hbm [shape: f32[24,32], index: 0, kind: input, shape index: {}]   ;;  %s968_s1 = inlined_call_operand.hbm [shape: f32[1,2304], index: 1, kind: input, shape index: {}]   ;;  %s969_s2 = inlined_call_operand.hbm [shape: f32[24,2304], index: 2, kind: output, shape index: {}]  }
   0x1   :  { %8 = vsyncpa [#allocation6], 0 }
   0x2   :  { %10 = vsyncpa [#allocation6 + $0x1], 0 }
   0x3   :  { %11 = vsyncpa [#allocation4], 0 }
   0x4   :  { %13 = vsyncpa [#allocation4 + $0x1], 0  ;;  %s723_s9 = smov 0   ;;  %s725_s10 = smov 0  }
   0x5   :  { %s727_s11 = smov 0   ;;  %s729_s12 = smov 0  }
   0x6   :  { %s731_s13 = smov 0   ;;  %s733_s14 = smov 0  }
   0x7 LB: > { %s456_s15 = sadd.s32 4294967295, %s696_s14   ;;  %s457_s16 = sadd.s32 4294967294, %s696_s14   ;;  %s696_s14 = sphi %s733_s14, %s19_s14   ;;  %s692_s13 = sphi %s731_s13, %s992_s13   ;;  %s688_s12 = sphi %s729_s12, %s991_s12   ;;  %s684_s11 = sphi %s727_s11, %s990_s11   ;;  %s680_s10 = sphi %s725_s10, %s989_s10   ;;  %s676_s9 = sphi %s723_s9, %s988_s9  }
   0x8   : > { %p77_p0 = scmp.ne.s32.totalorder %s680_s10, %s676_s9  ;;  %p757_p1 = scmp.eq.s32.totalorder %s456_s15, 0 }
   0x9   : > { %p761_p2 = scmp.eq.s32.totalorder %s456_s15, 1  ;;  %p109_p3 = scmp.eq.s32.totalorder %s457_s16, 1 }
   0xa   : > { %s974_s17 = scalar_select %p757_p1, 1, 0 }
   0xb   : > { %s975_s18 = scalar_select %p761_p2, 1, 0 }
   0xc   : > { %p767_p4 = por %p757_p1, %p77_p0  ;;  %p458_p5 = scmp.ge.s32.totalorder %s696_s14, 1 }
   0xd   : > { %p772_p6 = por %p109_p3, %p77_p0  ;;  %p116_p7 = scmp.lt.s32.totalorder %s696_s14, 3 }
   0xe   : > { %s976_s19 = scalar_select %p767_p4, 1, 0 }
   0xf   : > { %s977_s20 = scalar_select %p772_p6, 1, 0 }
  0x10   : > { %p777_p8 = pnand %p458_p5, %p116_p7  ;;  %s698_s22 = smov [#allocation2]  }
  0x11   : > { %s131_s23 = sshll.u32 %s698_s22, 4  ;;  %s28_s25 = sadd.s32 1, %s692_s13  ;;  %s132_s23 = int_to_ptr.vmem [resolvable:$true] %s131_s23 }
  0x12   : > { %s978_s21 = scalar_select %p777_p8, 1, 0 }
  0x13   : > { %p480_p9 = pneg %p777_p8  ;;  %s552_s28 = scalar_lea.hbm %s967_s0, 384 }
  0x14   : > { %p553_p12 = scmp.ne.s32.totalorder %s967_s0, %s552_s28  ;;  %p559_p5 = scmp.lt.u32.totalorder %s552_s28, %s967_s0 }
  0x15   : > { %p786_p11 = pnand %p480_p9, %p757_p1 }
  0x17   : > { %p554_p13 = pneg %p786_p11 }
  0x19   : > { %p555_p0 = pnand %p554_p13, %p553_p12 }
  0x1b   : > { %p556_p3 = pneg %p555_p0 }
  0x1d   : > { %p561_p7 = pnand %p559_p5, %p556_p3 }
  0x1f   : > { %564 = shalt.err (!%p561_p7)
}
  0x20   : > { %s565_s5 = scalar_lea.vmem %s132_s23, 384  ;;  %p573_p4 = scmp.lt.s32.totalorder %s132_s23, %s132_s23 }
  0x21   : > { %p566_p9 = scmp.ne.s32.totalorder %s132_s23, %s565_s5  ;;  %p574_p1 = scmp.lt.s32.totalorder %s565_s5, %s565_s5 }
  0x23   : > { %p568_p10 = pnand %p566_p9, %p554_p13  ;;  %p575_p8 = por %p574_p1, %p573_p4 }
  0x25   : > { %p569_p6 = pneg %p568_p10 }
  0x27   : > { %p576_p2 = pnand %p575_p8, %p569_p6 }
  0x29   : > { %579 = shalt.err (!%p576_p2)
}
  0x2a   : > { %s699_s6 = smov 128   ;;  %s700_s7 = smov 8  }
  0x2b   : > { %483 = dma.hbm_to_vmem [thread:$0]  (!%p786_p11), %s967_s0, 384, %s132_s23, [#allocation3], %s699_s6, %s699_s6, %s700_s7  }
  0x2c   : > { %p29_p1 = scmp.ge.s32.totalorder %s28_s25, 2  ;;  %s64_s16 = sadd.s32 1, %s684_s11 }
  0x2d   : > { %p71_p2 = scmp.ne.s32.totalorder %s684_s11, %s680_s10  ;;  %p72_p4 = scmp.eq.s32.totalorder %s696_s14, 0 }
  0x2e   : > { %s994_s25 = smov (%p29_p1, %s28_s25), 0  ;;  %p980_p8 = scmp.ne.s32.totalorder %s975_s18, 0 }
  0x2f   : > { %p73_p6 = por %p72_p4, %p71_p2  ;;  %s61_s26 = ssub.s32 %s692_s13, %s994_s25 }
  0x30   : > { %p815_p10 = por %p980_p8, %p71_p2  ;;  %p493_p12 = scmp.lt.s32.totalorder %s696_s14, 2 }
  0x31   : > { %p62_p13 = scmp.eq.s32.totalorder %s61_s26, 0  ;;  %s145_s24 = sand.u32 1, %s684_s11  }
  0x32   : > { %s469_s27 = smul.u32 9, %s145_s24  ;;  %p827_p11 = pnand %p493_p12, %p73_p6 }
  0x33   : > { %s824_s28 = scalar_select %p62_p13, %s684_s11, %s64_s16  }
  0x34   : > { %s467_s23 = smul.u32 144, %s692_s13  ;;  %s149_s29 = scalar_lea.vmem [#allocation5], %s469_s27 }
  0x35   : > { %s157_s30 = sshll.u32 %s149_s29, 4  ;;  %s146_s6 = scalar_lea.sflag [#allocation6], %s145_s24  ;;  %s836_s30 = int_to_ptr.vmem [resolvable:$true] %s157_s30 }
  0x36   : > { %s834_s5 = scalar_lea.hbm %s968_s1, %s467_s23  ;;  %p582_p3 = pneg %p827_p11 }
  0x37   : > { %s580_s7 = scalar_lea.hbm %s834_s5, 144  ;;  %s585_s16 = scalar_lea.hbm %s968_s1, 288 }
  0x38   : > { %p581_p0 = scmp.ne.s32.totalorder %s834_s5, %s580_s7  ;;  %p586_p9 = scmp.lt.u32.totalorder %s834_s5, %s968_s1 }
  0x39   : > { %p587_p1 = scmp.lt.u32.totalorder %s585_s16, %s580_s7  ;;  %p589_p4 = scmp.lt.u32.totalorder %s580_s7, %s834_s5 }
  0x3a   : > { %p583_p5 = pnand %p582_p3, %p581_p0 }
  0x3b   : > { %p588_p2 = por %p587_p1, %p586_p9 }
  0x3c   : > { %p584_p7 = pneg %p583_p5 }
  0x3d   : > { %p590_p6 = por %p589_p4, %p588_p2 }
  0x3f   : > { %p591_p8 = pnand %p590_p6, %p584_p7 }
  0x41   : > { %594 = shalt.err (!%p591_p8)
}
  0x42   : > { %s595_s24 = scalar_lea.vmem %s836_s30, 144  ;;  %s701_s23 = smov [#allocation5]  }
  0x43   : > { %p596_p12 = scmp.ne.s32.totalorder %s836_s30, %s595_s24  ;;  %s600_s29 = sshll.u32 %s701_s23, 4  ;;  %s601_s29 = int_to_ptr.vmem [resolvable:$false] %s600_s29 }
  0x44   : > { %s602_s4 = scalar_lea.vmem %s601_s29, 288  ;;  %p603_p5 = scmp.lt.s32.totalorder %s836_s30, %s601_s29 }
  0x45   : > { %p598_p13 = pnand %p596_p12, %p582_p3  ;;  %p604_p9 = scmp.lt.s32.totalorder %s602_s4, %s595_s24 }
  0x47   : > { %p599_p0 = pneg %p598_p13  ;;  %p605_p1 = por %p604_p9, %p603_p5 }
  0x49   : > { %p606_p2 = pnand %p605_p1, %p599_p0 }
  0x4b   : > { %609 = shalt.err (!%p606_p2)
}
  0x4c   : > { %487 = dma.hbm_to_vmem [thread:$0]  (!%p827_p11), %s834_s5, 144, %s836_s30, %s146_s6  }
  0x4d   : > { %p983_p7 = scmp.ne.s32.totalorder %s978_s21, 0 }
  0x4e   : > { %p984_p3 = scmp.ne.s32.totalorder (!%p983_p7), %s974_s17, 0 }
  0x4f   : > { %166 = sbr.rel (%p983_p7) target bundleno = 356 (0x164), region = 28 }
  0x56   : > { %663 = dma.done.wait (%p984_p3), [#allocation3], 384  }
  0x57   : > { %665 = vsyncadd (%p984_p3), [#allocation3], 4294966912  ;;  %s870_s18 = sand.u32 1, %s680_s10   ;;  %p985_p4 = scmp.ne.s32.totalorder %s976_s19, 0 }
  0x58   : > { %s470_s7 = smul.u32 9, %s870_s18  ;;  %s173_s3 = scalar_lea.sflag [#allocation6], %s870_s18 }
  0x5a   : > { %s176_s8 = scalar_lea.vmem [#allocation5], %s470_s7 }
  0x5b   : > { %667 = dma.done.wait (%p985_p4), %s173_s3, 144  }
  0x5c   : > { %669 = vsyncadd (%p985_p4), %s173_s3, 4294967152  ;;  %v201_v0 = vld [vmem:[#allocation2] sm:$0xff]  ;;  %v203_v1 = vld [vmem:[#allocation2 + $0x10] sm:$0xff]  ;;  %s702_s21 = smov 32   ;;  %vm216_vm0 = vcmask 261120   ;;  %s703_s17 = smov 64   ;;  %v238_v9 = vlaneseq }
  0x5d   : > { %207 = vrot.lane.b32.xlu0 %v201_v0, %s702_s21  ;;  %211 = vrot.lane.b32.xlu1 %v203_v1, %s702_s21  ;;  %v202_v2 = vld [vmem:[#allocation2 + $0x8] sm:$0xff]  ;;  %v236_v14 = vld [vmem:[%s176_s8] sm:$0x7]  ;;  %v271_v15 = vld [vmem:[%s176_s8 + $0x3] sm:$0x7]  ;;  %s471_s19 = smul.u32 216, %s870_s18 }
  0x5e   : > { %v239_v10 = vshrl.u32 %v238_v9, 7  ;;  %v306_v16 = vld [vmem:[%s176_s8 + $0x6] sm:$0x7]  ;;  %vm232_vm1 = vcmask 523264   ;;  %s468_s5 = smul.u32 1152, %s688_s12  ;;  %s342_s26 = scalar_lea.sflag [#allocation4], %s870_s18 }
  0x5f   : > { %s880_s30 = scalar_lea.vmem [#allocation7], %s471_s19  ;;  %s704_s24 = smov [#allocation7]  }
  0x60   : > { %v240_v11 = vsub.s32 0, %v239_v10  ;;  %v244_v12 = vsub.s32 1, %v239_v10  ;;  %v248_v13 = vsub.s32 2, %v239_v10  ;;  %s358_s12 = sshll.u32 %s880_s30, 4  ;;  %s902_s16 = scalar_lea.hbm %s969_s2, %s468_s5  ;;  %s908_s12 = int_to_ptr.vmem [resolvable:$true] %s358_s12 }
  0x61   : > { %209 = vrot.lane.b32.xlu0 %v202_v2, %s702_s21  ;;  %s610_s27 = scalar_lea.vmem %s908_s12, 3456  ;;  %s614_s23 = sshll.u32 %s704_s24, 4  ;;  %s615_s23 = int_to_ptr.vmem [resolvable:$false] %s614_s23 }
  0x62   : > { %v241_v17 = vrot.slane %v236_v14, %v240_v11  ;;  %v245_v18 = vrot.slane %v236_v14, %v244_v12  ;;  %v249_v19 = vrot.slane %v236_v14, %v248_v13  ;;  %v276_v20 = vrot.slane %v271_v15, %v240_v11  ;;  %p611_p11 = scmp.ne.s32.totalorder %s908_s12, %s610_s27  ;;  %s616_s29 = scalar_lea.vmem %s615_s23, 6912 }
  0x63   : > { %v280_v21 = vrot.slane %v271_v15, %v244_v12  ;;  %v284_v22 = vrot.slane %v271_v15, %v248_v13  ;;  %v311_v23 = vrot.slane %v306_v16, %v240_v11  ;;  %v315_v24 = vrot.slane %v306_v16, %v244_v12  ;;  %p617_p12 = scmp.lt.s32.totalorder %s908_s12, %s615_s23  ;;  %p618_p13 = scmp.lt.s32.totalorder %s616_s29, %s610_s27 }
  0x64   : > { %v319_v25 = vrot.slane %v306_v16, %v248_v13  ;;  %p612_p6 = pnand %p611_p11, %p815_p10 }
  0x65   : > { %p619_p0 = por %p618_p13, %p617_p12 }
  0x66   : > { %p613_p8 = pneg %p612_p6 }
  0x68   : > { %p620_p5 = pnand %p619_p0, %p613_p8 }
  0xcf   : > { %v208_v3 = vpop.permute.xlu0 %207  ;;  %v212_v4 = vpop.permute.xlu1 %211 }
  0xd0   : > { %v217_v5 = vsel %vm216_vm0, %v201_v0, %v208_v3  ;;  %v219_v6 = vsel %vm216_vm0, %v203_v1, %v212_v4 }
  0xd1   : > { %223 = vrot.lane.b32.xlu1 %v217_v5, %s703_s17 }
  0xd3   : > { %v210_v7 = vpop.permute.xlu0 %209 }
  0xd4   : > { %v218_v8 = vsel %vm216_vm0, %v202_v2, %v210_v7 }
  0xd5   : > { %227 = vrot.lane.b32.xlu1 %v219_v6, %s703_s17  ;;  %225 = vrot.lane.b32.xlu0 %v218_v8, %s703_s17 }
 0x143   : > { %v224_v26 = vpop.permute.xlu1 %223 }
 0x144   : > { %v233_v27 = vsel %vm232_vm1, %v217_v5, %v224_v26 }
 0x145   : > { %v253_v28 = vmul.f32 %v241_v17, %v233_v27  ;;  %v254_v29 = vmul.f32 %v245_v18, %v233_v27  ;;  %v255_v30 = vmul.f32 %v249_v19, %v233_v27  ;;  %v288_v31 = vmul.f32 %v276_v20, %v233_v27 }
 0x146   : > { %v289_v32 = vmul.f32 %v280_v21, %v233_v27  ;;  %v290_v33 = vmul.f32 %v284_v22, %v233_v27  ;;  %v323_v34 = vmul.f32 %v311_v23, %v233_v27  ;;  %v324_v35 = vmul.f32 %v315_v24, %v233_v27 }
 0x147   : > { %262 = vst [vmem:[%s880_s30] sm:$0xff] %v253_v28  ;;  %263 = vst [vmem:[%s880_s30 + $0x8] sm:$0xff] %v254_v29  ;;  %v325_v36 = vmul.f32 %v319_v25, %v233_v27  ;;  %v228_v37 = vpop.permute.xlu1 %227  ;;  %v226_v38 = vpop.permute.xlu0 %225 }
 0x148   : > { %264 = vst [vmem:[%s880_s30 + $0x10] sm:$0xff] %v255_v30  ;;  %297 = vst [vmem:[%s880_s30 + $0x18] sm:$0xff] %v288_v31  ;;  %v235_v39 = vsel %vm232_vm1, %v219_v6, %v228_v37  ;;  %v234_v40 = vsel %vm232_vm1, %v218_v8, %v226_v38 }
 0x149   : > { %298 = vst [vmem:[%s880_s30 + $0x20] sm:$0xff] %v289_v32  ;;  %299 = vst [vmem:[%s880_s30 + $0x28] sm:$0xff] %v290_v33  ;;  %v259_v41 = vmul.f32 %v241_v17, %v235_v39  ;;  %v260_v42 = vmul.f32 %v245_v18, %v235_v39  ;;  %v261_v43 = vmul.f32 %v249_v19, %v235_v39 }
 0x14a   : > { %332 = vst [vmem:[%s880_s30 + $0x30] sm:$0xff] %v323_v34  ;;  %333 = vst [vmem:[%s880_s30 + $0x38] sm:$0xff] %v324_v35  ;;  %v294_v44 = vmul.f32 %v276_v20, %v235_v39  ;;  %v295_v45 = vmul.f32 %v280_v21, %v235_v39  ;;  %v296_v46 = vmul.f32 %v284_v22, %v235_v39 }
 0x14b   : > { %334 = vst [vmem:[%s880_s30 + $0x40] sm:$0xff] %v325_v36  ;;  %v329_v47 = vmul.f32 %v311_v23, %v235_v39  ;;  %v330_v48 = vmul.f32 %v315_v24, %v235_v39  ;;  %268 = vst [vmem:[%s880_s30 + $0x90] sm:$0xff] %v259_v41  ;;  %v331_v49 = vmul.f32 %v319_v25, %v235_v39 }
 0x14c   : > { %269 = vst [vmem:[%s880_s30 + $0x98] sm:$0xff] %v260_v42  ;;  %270 = vst [vmem:[%s880_s30 + $0xa0] sm:$0xff] %v261_v43  ;;  %v256_v50 = vmul.f32 %v241_v17, %v234_v40  ;;  %v257_v51 = vmul.f32 %v245_v18, %v234_v40  ;;  %v258_v52 = vmul.f32 %v249_v19, %v234_v40 }
 0x14d   : > { %303 = vst [vmem:[%s880_s30 + $0xa8] sm:$0xff] %v294_v44  ;;  %304 = vst [vmem:[%s880_s30 + $0xb0] sm:$0xff] %v295_v45  ;;  %v291_v53 = vmul.f32 %v276_v20, %v234_v40  ;;  %v292_v54 = vmul.f32 %v280_v21, %v234_v40  ;;  %v293_v55 = vmul.f32 %v284_v22, %v234_v40 }
 0x14e   : > { %305 = vst [vmem:[%s880_s30 + $0xb8] sm:$0xff] %v296_v46  ;;  %338 = vst [vmem:[%s880_s30 + $0xc0] sm:$0xff] %v329_v47  ;;  %v326_v56 = vmul.f32 %v311_v23, %v234_v40  ;;  %v327_v57 = vmul.f32 %v315_v24, %v234_v40  ;;  %v328_v58 = vmul.f32 %v319_v25, %v234_v40 }
 0x14f   : > { %339 = vst [vmem:[%s880_s30 + $0xc8] sm:$0xff] %v330_v48  ;;  %340 = vst [vmem:[%s880_s30 + $0xd0] sm:$0xff] %v331_v49 }
 0x150   : > { %265 = vst [vmem:[%s880_s30 + $0x48] sm:$0xff] %v256_v50  ;;  %266 = vst [vmem:[%s880_s30 + $0x50] sm:$0xff] %v257_v51 }
 0x151   : > { %267 = vst [vmem:[%s880_s30 + $0x58] sm:$0xff] %v258_v52  ;;  %300 = vst [vmem:[%s880_s30 + $0x60] sm:$0xff] %v291_v53 }
 0x152   : > { %301 = vst [vmem:[%s880_s30 + $0x68] sm:$0xff] %v292_v54  ;;  %302 = vst [vmem:[%s880_s30 + $0x70] sm:$0xff] %v293_v55 }
 0x153   : > { %335 = vst [vmem:[%s880_s30 + $0x78] sm:$0xff] %v326_v56  ;;  %336 = vst [vmem:[%s880_s30 + $0x80] sm:$0xff] %v327_v57 }
 0x154   : > { %337 = vst [vmem:[%s880_s30 + $0x88] sm:$0xff] %v328_v58 }
 0x155   : > { %623 = shalt.err (!%p620_p5)
}
 0x156   : > { %s624_s4 = scalar_lea.hbm %s902_s16, 3456  ;;  %s628_s8 = scalar_lea.hbm %s969_s2, 6912 }
 0x157   : > { %p625_p9 = scmp.ne.s32.totalorder %s902_s16, %s624_s4  ;;  %p629_p7 = scmp.lt.u32.totalorder %s902_s16, %s969_s2 }
 0x158   : > { %p630_p3 = scmp.lt.u32.totalorder %s628_s8, %s624_s4  ;;  %p632_p11 = scmp.lt.u32.totalorder %s624_s4, %s902_s16 }
 0x159   : > { %p626_p1 = pnand %p625_p9, %p815_p10 }
 0x15a   : > { %p631_p4 = por %p630_p3, %p629_p7 }
 0x15b   : > { %p627_p2 = pneg %p626_p1 }
 0x15c   : > { %p633_p6 = por %p632_p11, %p631_p4 }
 0x15e   : > { %p634_p8 = pnand %p633_p6, %p627_p2 }
 0x160   : > { %637 = shalt.err (!%p634_p8)
}
 0x161   : > { %s705_s19 = smov 1152   ;;  %s706_s30 = smov 2304  }
 0x162   : > { %s707_s5 = smov 72  }
 0x163   : > { %478 = dma.vmem_to_hbm [thread:$0]  (%p815_p10), %s908_s12, 3456, %s902_s16, %s342_s26, %s705_s19, %s706_s30, %s707_s5  }
 0x164 PF: > { %s373_s6 = sand.u32 1, %s676_s9   ;;  %p986_p12 = scmp.ne.s32.totalorder %s977_s20, 0 }
 0x165   : > { %p987_p13 = scmp.ge.s32.totalorder %s696_s14, 2  ;;  %s374_s15 = scalar_lea.sflag [#allocation4], %s373_s6 }
 0x167   : > { %p489_p0 = pnand %p987_p13, %p986_p12 }
 0x169   : > { %671 = dma.done.wait (!%p489_p0), %s374_s15, 3456  }
 0x16a   : > { %673 = vsyncadd (!%p489_p0), %s374_s15, 4294963840  ;;  %s19_s14 = sadd.s32 1, %s696_s14   ;;  %s988_s9 = smov %s680_s10 }
 0x16b   : > { %p16_p5 = scmp.ge.s32.totalorder %s19_s14, 4   ;;  %s989_s10 = smov %s684_s11 }
 0x16c   : > { %s990_s11 = smov %s824_s28  ;;  %s991_s12 = smov %s692_s13 }
 0x16d   : > { %s992_s13 = smov %s994_s25  ;;  %18 = sbr.rel (!%p16_p5) target bundleno = 7 (0x7), region = 79 }
 0x174   :  { %379 = vsyncpa [#allocation3], 1 }
 0x175   :  { %381 = vsyncpa [#allocation3 + $0x1], 1 }
 0x176   :  { %382 = vsyncpa [#allocation6], 1 }
 0x177   :  { %384 = vsyncpa [#allocation6 + $0x1], 1 }
 0x178   :  { %385 = vsyncpa [#allocation4], 1 }
 0x179   :  { %387 = vsyncpa [#allocation4 + $0x1], 1 }

</bundles_post_ra>
